<compile_context>
chip_gen: v7x
topology: tpu7x:2x2x1
jax: 0.10.0
libtpu: 0.0.40
codegen_flags: <defaults>
</compile_context>

<pallas_src>
import jax
import jax.numpy as jnp
from jax.experimental import pallas as pl
from jax.experimental.pallas import tpu as pltpu


def _linear_add_kernel(x_ref, w_ref, bo_ref, o_ref):
    # x:  [1, IN]  f32
    # w:  [OUT, IN] f32
    # bo: [1, OUT] f32  (bias + other, pre-combined at init time)
    x = x_ref[...]                                   # [1, IN]
    w = w_ref[...]                                   # [OUT, IN]
    # VPU contraction on the weight tile: x sublane-broadcasts over the OUT
    # rows for free; lane reduce over IN.  No rank-3 intermediate, no MXU.
    acc = jnp.sum(w * x, axis=-1)                    # [OUT] f32
    o_ref[...] = (acc[None, :] + bo_ref[...]).astype(o_ref.dtype)  # [1, OUT]


def linear_add(x, weight, bias_plus_other):
    """x: [1, IN] f32, weight: [OUT, IN] f32, bias_plus_other: [1, OUT] f32."""
    B, _ = x.shape
    assert B == 1, "kernel specialized for the module's B=1 input (see NOTE)"
    OUT = weight.shape[0]
    vmem = pl.BlockSpec(memory_space=pltpu.MemorySpace.VMEM)
    return pl.pallas_call(
        _linear_add_kernel,
        out_shape=jax.ShapeDtypeStruct((B, OUT), jnp.float32),
        in_specs=[vmem, vmem, vmem],
        out_specs=vmem,
    )(x, weight, bias_plus_other)


if __name__ == "__main__":
    key = jax.random.PRNGKey(0)
    kx, kw, kb = jax.random.split(key, 3)

    B, IN, OUT = 1, 8, 4
    x = jax.random.normal(kx, (B, IN), dtype=jnp.float32)

    # Parameter init mimicking torch.nn.Linear(8, 4):
    #   weight: [OUT, IN], bias: [OUT]  (uniform in +/- 1/sqrt(IN))
    bound = 1.0 / (IN ** 0.5)
    weight = jax.random.uniform(kw, (OUT, IN), minval=-bound, maxval=bound,
                                dtype=jnp.float32)
    bias = jax.random.uniform(kb, (OUT,), minval=-bound, maxval=bound,
                              dtype=jnp.float32)

    other = jnp.array([4, 5, 6, 7], dtype=jnp.int32)

    # Done ONCE at parameter-init time (kernel-invariant): fold `other` into
    # the bias (int -> f32 promotion matches torch), keep it as a 2-D row.
    bias_plus_other = (bias + other.astype(jnp.float32)).reshape(1, OUT)

    out = linear_add(x, weight, bias_plus_other)
    jax.block_until_ready(out)

    # Pure-JAX reference check against the original module semantics.
    ref = x @ weight.T + bias + other.astype(jnp.float32)
    assert jnp.allclose(out, ref, atol=1e-5, rtol=1e-5), (out, ref)

    print("KERNEL_OK")
</pallas_src>

<mosaic_0001>
module attributes {stable_mosaic.version = 11 : i64} {
  func.func @_linear_add_kernel(%arg0: memref<1x8xf32, #tpu.memory_space<vmem>>, %arg1: memref<4x8xf32, #tpu.memory_space<vmem>>, %arg2: memref<1x4xf32, #tpu.memory_space<vmem>>, %arg3: memref<1x4xf32, #tpu.memory_space<vmem>>) attributes {dimension_semantics = [], scalar_prefetch = 0 : i64, scratch_operands = 0 : i64, tpu.core_type = #tpu.core_type<tc>} {
    %c0 = arith.constant 0 : index
    %c0_0 = arith.constant 0 : index
    %0 = vector.load %arg0[%c0, %c0_0] : memref<1x8xf32, #tpu.memory_space<vmem>>, vector<1x8xf32>
    %c0_1 = arith.constant 0 : index
    %c0_2 = arith.constant 0 : index
    %1 = vector.load %arg1[%c0_1, %c0_2] : memref<4x8xf32, #tpu.memory_space<vmem>>, vector<4x8xf32>
    %2 = vector.broadcast %0 : vector<1x8xf32> to vector<4x8xf32>
    %3 = arith.mulf %1, %2 : vector<4x8xf32>
    %cst = arith.constant dense<0.000000e+00> : vector<4xf32>
    %4 = vector.multi_reduction <add>, %3, %cst [1] : vector<4x8xf32> to vector<4xf32>
    %5 = vector.shape_cast %4 : vector<4xf32> to vector<1x4xf32>
    %c0_3 = arith.constant 0 : index
    %c0_4 = arith.constant 0 : index
    %6 = vector.load %arg2[%c0_3, %c0_4] : memref<1x4xf32, #tpu.memory_space<vmem>>, vector<1x4xf32>
    %7 = arith.addf %5, %6 : vector<1x4xf32>
    %c0_5 = arith.constant 0 : index
    %c0_6 = arith.constant 0 : index
    %8 = vector.load %arg3[%c0_5, %c0_6] : memref<1x4xf32, #tpu.memory_space<vmem>>, vector<1x4xf32>
    tpu.vector_store %arg3[%c0_5, %c0_6], %7 {strides = array<i32>} : memref<1x4xf32, #tpu.memory_space<vmem>>, vector<1x4xf32>,
    return
  }
}

</mosaic_0001>

<bundles_post_ra>
// kernel: tpu_custom_call.1
= control target key start
LH: loop header
LB: loop body
LE: loop exit
PB: predicated region body
PF: predicated region fallthrough
CT: control target
= control target key end

     0   :  { %8 = vsyncpa [#allocation3], 0  ;;  %s235_s0 = inlined_call_operand.hbm [shape: f32[1,8], index: 0, kind: input, shape index: {}]   ;;  %s236_s1 = inlined_call_operand.hbm [shape: f32[4,8], index: 1, kind: input, shape index: {}]   ;;  %s237_s2 = inlined_call_operand.vmem [shape: f32[1,4], index: 2, kind: input, shape index: {}]   ;;  %s238_s3 = inlined_call_operand.hbm [shape: f32[1,4], index: 3, kind: output, shape index: {}]  }
   0x1   :  { %9 = vsyncpa [#allocation6], 0 }
   0x2   :  { %10 = vsyncpa [#allocation4], 0  ;;  %s172_s12 = smov [#allocation2]   ;;  %s173_s14 = smov [#allocation5]  }
   0x3   :  { %s17_s13 = sshll.u32 %s172_s12, 4  ;;  %s27_s15 = sshll.u32 %s173_s14, 4  ;;  %s18_s13 = int_to_ptr.vmem [resolvable:$true] %s17_s13  ;;  %s28_s15 = int_to_ptr.vmem [resolvable:$true] %s27_s15 }
   0x4   :  { %s100_s18 = scalar_lea.hbm %s235_s0, 16 }
   0x5   :  { %p101_p0 = scmp.ne.s32.totalorder %s235_s0, %s100_s18  ;;  %p104_p1 = scmp.lt.u32.totalorder %s100_s18, %s235_s0 }
   0x7   :  { %p106_p2 = pnand %p104_p1, %p101_p0 }
   0x9   :  { %109 = shalt.err (!%p106_p2)
}
   0xa   :  { %s110_s23 = scalar_lea.vmem %s18_s13, 16  ;;  %s114_s24 = scalar_lea.vmem %s18_s13, 32 }
   0xb   :  { %p111_p3 = scmp.ne.s32.totalorder %s18_s13, %s110_s23  ;;  %p115_p4 = scmp.lt.s32.totalorder %s18_s13, %s18_s13 }
   0xc   :  { %p116_p5 = scmp.lt.s32.totalorder %s114_s24, %s110_s23 }
   0xe   :  { %p117_p6 = por %p116_p5, %p115_p4 }
  0x10   :  { %p118_p7 = pnand %p117_p6, %p111_p3 }
  0x12   :  { %121 = shalt.err (!%p118_p7)
}
  0x13   :  { %20 = dma.hbm_to_vmem [thread:$0]  %s235_s0, 16, %s18_s13, [#allocation3]  }
  0x14   :  { %s122_s29 = scalar_lea.hbm %s236_s1, 64 }
  0x15   :  { %p123_p8 = scmp.ne.s32.totalorder %s236_s1, %s122_s29  ;;  %p126_p9 = scmp.lt.u32.totalorder %s122_s29, %s236_s1 }
  0x17   :  { %p128_p10 = pnand %p126_p9, %p123_p8 }
  0x19   :  { %131 = shalt.err (!%p128_p10)
}
  0x1a   :  { %s132_s7 = scalar_lea.vmem %s28_s15, 64  ;;  %p137_p12 = scmp.lt.s32.totalorder %s28_s15, %s28_s15 }
  0x1b   :  { %p133_p11 = scmp.ne.s32.totalorder %s28_s15, %s132_s7  ;;  %p138_p13 = scmp.lt.s32.totalorder %s132_s7, %s132_s7 }
  0x1d   :  { %p139_p0 = por %p138_p13, %p137_p12 }
  0x1f   :  { %p140_p1 = pnand %p139_p0, %p133_p11 }
  0x21   :  { %143 = shalt.err (!%p140_p1)
}
  0x22   :  { %30 = dma.hbm_to_vmem [thread:$0]  %s236_s1, 64, %s28_s15, [#allocation6]  }
  0x23   :  { %166 = dma.done.wait [#allocation3], 16  }
  0x24   :  { %167 = vsyncadd [#allocation3], 4294967280 }
  0x25   :  { %168 = dma.done.wait [#allocation6], 64  }
  0x26   :  { %169 = vsyncadd [#allocation6], 4294967232  ;;  %v92_v0 = vld [vmem:[#allocation2] ss:$0 sm:$0xff]  ;;  %v40_v1 = vld [vmem:[#allocation5] sm:$0xf]  ;;  %v67_v9 = vlaneseq }
  0x27   :  { %vm48_vm0 = vcmask 60416   ;;  %v47_v2 = vmul.f32 %v92_v0, %v40_v1  ;;  %v93_v4 = vld [vmem:[%s237_s2] ss:$0 sm:$0xff]  ;;  %v174_v5 = vmov 0   ;;  %s175_s1 = smov [#allocation7]   ;;  %vm74_vm1 = vcmask 24576  }
  0x28   :  { %98 = vset.pattern.permute.xlu1 %v174_v5  ;;  %99 = vset.pattern.permute.xlu0 %v174_v5  ;;  %v68_v10 = vand.u32 127, %v67_v9  ;;  %v70_v11 = vshrl.u32 %v67_v9, 7  ;;  %s82_s11 = sshll.u32 %s175_s1, 4  ;;  %s83_s11 = int_to_ptr.vmem [resolvable:$true] %s82_s11 }
  0x29   :  { %v49_v3 = vsel %vm48_vm0, %v47_v2, 0.0  ;;  %s144_s2 = scalar_lea.vmem %s83_s11, 16  ;;  %s148_s12 = scalar_lea.vmem %s83_s11, 32 }
  0x2a   :  { %50 = vadd.xlane.f32.xlu0 %v49_v3  ;;  %v71_v12 = vsub.s32 %v68_v10, %v70_v11  ;;  %p145_p2 = scmp.ne.s32.totalorder %s83_s11, %s144_s2  ;;  %p149_p3 = scmp.lt.s32.totalorder %s83_s11, %s83_s11 }
  0x2b   :  { %p150_p4 = scmp.lt.s32.totalorder %s148_s12, %s144_s2 }
  0x2d   :  { %p151_p5 = por %p150_p4, %p149_p3 }
  0x2f   :  { %p152_p6 = pnand %p151_p5, %p145_p2 }
  0x40   :  { %59 = vbcast.lane.b32.xlu0 %v93_v4, 256 }
  0xb7   :  { %v51_v6 = vpop.xlane.xlu0 %50 }
  0xbb   :  { %v60_v7 = vpop.permute.xlu0 %59 }
  0xbc   :  { %v62_v8 = vadd.f32 %v60_v7, %v51_v6 }
  0xbe   :  { %65 = vperm.xlu1 %98, %v62_v8  }
 0x13d   :  { %v66_v13 = vpop.permute.xlu1 %65 }
 0x13e   :  { %v72_v14 = vrot.slane %v66_v13, %v71_v12 }
 0x140   :  { %75 = vst.msk [vmem:[#allocation7] sm:$0x1] %vm74_vm1, %v72_v14 }
 0x141   :  { %155 = shalt.err (!%p152_p6)
}
 0x142   :  { %s156_s15 = scalar_lea.hbm %s238_s3, 16 }
 0x143   :  { %p157_p7 = scmp.ne.s32.totalorder %s238_s3, %s156_s15  ;;  %p160_p8 = scmp.lt.u32.totalorder %s156_s15, %s238_s3 }
 0x145   :  { %p162_p9 = pnand %p160_p8, %p157_p7 }
 0x147   :  { %165 = shalt.err (!%p162_p9)
}
 0x148   :  { %85 = dma.vmem_to_hbm [thread:$0]  %s83_s11, 16, %s238_s3, [#allocation4]  }
 0x149   :  { %170 = dma.done.wait [#allocation4], 16  }
 0x14a   :  { %171 = vsyncadd [#allocation4], 4294967280 }
 0x14b   :  { %89 = vsyncpa [#allocation3], 1 }
 0x14c   :  { %90 = vsyncpa [#allocation6], 1 }
 0x14d   :  { %91 = vsyncpa [#allocation4], 1 }

</bundles_post_ra>
